<compile_context>
chip_gen: v7x
topology: tpu7x:2x2x1
jax: 0.10.0
libtpu: 0.0.40
codegen_flags: <defaults>
</compile_context>

<pallas_src>
import functools

import jax
import jax.numpy as jnp
from jax.experimental import pallas as pl
from jax.experimental.pallas import tpu as pltpu


LANE = 128     # vreg lane width: feature dims padded to a multiple of this
SUBLANE = 8    # f32 sublane height: batch tiles are a multiple of this


def _round_up(x, m):
    return (x + m - 1) // m * m


def dqn_kernel(x_ref, w1_ref, b1_ref, w2_ref, b2_ref, w3_ref, b3_ref, o_ref,
               *, approx_recip):
    # Cast x to the matmul dtype in-kernel (free VPU filler under the MXU;
    # avoids a separate HBM pad/cast pass over the activations in the wrapper).
    x = x_ref[...].astype(w1_ref.dtype)

    # Layer 1: Linear + ReLU (low-precision operands, f32 MXU accumulation).
    h1 = jnp.dot(x, w1_ref[...], preferred_element_type=jnp.float32)
    h1 = jnp.maximum(h1 + b1_ref[...], 0.0)

    # Layer 2: Linear + ReLU.
    h2 = jnp.dot(h1.astype(w2_ref.dtype), w2_ref[...],
                 preferred_element_type=jnp.float32)
    h2 = jnp.maximum(h2 + b2_ref[...], 0.0)

    # Final: Linear + Sigmoid (Questionnaire head).
    z = jnp.dot(h2.astype(w3_ref.dtype), w3_ref[...],
                preferred_element_type=jnp.float32)
    z = z + b3_ref[...]
    # sigmoid(z) = 1 / (1 + exp(-z)): exp goes to the EUP; with approx_recip the
    # reciprocal also uses the EUP slot, keeping the epilogue off the VPU path.
    o_ref[...] = pl.reciprocal(1.0 + jnp.exp(-z),
                               approx=approx_recip).astype(o_ref.dtype)


def prepare_params(w1, b1, w2, b2, w3, b3, *, compute_dtype=jnp.bfloat16):
    """One-time parameter preparation. Call once, reuse across forward calls.

    Hidden/output feature dims are zero-padded to multiples of 128 so the MXU
    sees full lanes and the output store is lane-dense; zero padding keeps the
    math exact (padded columns have zero weights + zero bias, stay 0 through
    ReLU, and padded output lanes are sliced off in the wrapper).  w1's input
    rows are intentionally NOT padded so `x` can be fed to the kernel as-is.
    """
    input_dim, hidden_dim = w1.shape
    output_dim = w3.shape[1]
    hid_p = _round_up(hidden_dim, LANE)
    out_p = _round_up(output_dim, LANE)

    f32 = jnp.float32

    def pad2(a, rows, cols):
        a = a.reshape((-1, a.shape[-1])).astype(f32)
        return jnp.pad(a, ((0, rows - a.shape[0]), (0, cols - a.shape[1])))

    return dict(
        w1=pad2(w1, input_dim, hid_p).astype(compute_dtype),
        b1=pad2(b1, 1, hid_p),                      # biases stay f32 (epilogue)
        w2=pad2(w2, hid_p, hid_p).astype(compute_dtype),
        b2=pad2(b2, 1, hid_p),
        w3=pad2(w3, hid_p, out_p).astype(compute_dtype),
        b3=pad2(b3, 1, out_p),
        output_dim=output_dim,
        compute_dtype=jnp.dtype(compute_dtype),
    )


def dqn_forward(x, params, *, tile_m=1024):
    """x: (n, input_dim) f32; params from prepare_params.
    Returns (n, output_dim) = sigmoid(relu(relu(x@w1+b1)@w2+b2)@w3+b3)."""
    n, input_dim = x.shape
    w1, b1 = params["w1"], params["b1"]
    w2, b2 = params["w2"], params["b2"]
    w3, b3 = params["w3"], params["b3"]
    output_dim = params["output_dim"]
    compute_dtype = params["compute_dtype"]
    assert w1.shape[0] == input_dim
    hid_p = w1.shape[1]
    out_p = w3.shape[1]

    # ---- Batch tiling: minimal padding, and >=2 grid steps when the batch
    # allows it so the "parallel" axis can shard across both TCs on v7x.
    if n >= 2 * SUBLANE:
        tile_m = min(tile_m, _round_up(pl.cdiv(n, 2), SUBLANE))
    tile_m = max(SUBLANE, min(tile_m, _round_up(n, SUBLANE)))
    grid_m = pl.cdiv(n, tile_m)
    tile_m = _round_up(pl.cdiv(n, grid_m), SUBLANE)   # <8 padded rows per tile
    n_p = grid_m * tile_m

    # Pad batch rows only when needed (typical power-of-two replay batches: no-op).
    x_p = x if n_p == n else jnp.pad(x, ((0, n_p - n), (0, 0)))

    # Constant index map -> weights/biases DMA'd once, VMEM-resident across steps.
    def resident(a):
        nd = a.ndim
        return pl.BlockSpec(a.shape, lambda i, _nd=nd: (0,) * _nd)

    out_dtype = compute_dtype   # bf16 store on the fast path halves output HBM bytes
    flops = 2 * n_p * (input_dim * hid_p + hid_p * hid_p + hid_p * out_p)
    bytes_accessed = int(
        x_p.size * x_p.dtype.itemsize
        + sum(a.size * a.dtype.itemsize for a in (w1, b1, w2, b2, w3, b3))
        + n_p * out_p * jnp.dtype(out_dtype).itemsize)

    out_padded = pl.pallas_call(
        functools.partial(
            dqn_kernel,
            approx_recip=(compute_dtype != jnp.dtype(jnp.float32))),
        out_shape=jax.ShapeDtypeStruct((n_p, out_p), out_dtype),
        grid=(grid_m,),
        in_specs=[
            # Full-extent last dim (== input_dim) is legal and avoids padding x.
            pl.BlockSpec((tile_m, input_dim), lambda i: (i, 0)),
            resident(w1), resident(b1),
            resident(w2), resident(b2),
            resident(w3), resident(b3),
        ],
        out_specs=pl.BlockSpec((tile_m, out_p), lambda i: (i, 0)),
        compiler_params=pltpu.CompilerParams(
            dimension_semantics=("parallel",),   # megacore-shard batch on v7x
        ),
        cost_estimate=pl.CostEstimate(
            flops=flops,
            transcendentals=n_p * out_p,          # one exp per output element
            bytes_accessed=bytes_accessed,
        ),
    )(x_p, w1, b1, w2, b2, w3, b3)

    # TODO(synk): in production keep this slice fused into the downstream
    # consumer instead of materializing the padded output here.
    return out_padded[:n, :output_dim]


def init_params(key, input_dim, hidden_dim, output_dim):
    # PyTorch-like uniform(-1/sqrt(fan_in), 1/sqrt(fan_in)) init.
    ks = jax.random.split(key, 6)

    def lin(kw, kb, fan_in, fan_out):
        bound = 1.0 / jnp.sqrt(fan_in)
        w = jax.random.uniform(kw, (fan_in, fan_out), jnp.float32, -bound, bound)
        b = jax.random.uniform(kb, (1, fan_out), jnp.float32, -bound, bound)
        return w, b

    w1, b1 = lin(ks[0], ks[1], input_dim, hidden_dim)
    w2, b2 = lin(ks[2], ks[3], hidden_dim, hidden_dim)
    w3, b3 = lin(ks[4], ks[5], hidden_dim, output_dim)
    return w1, b1, w2, b2, w3, b3


def reference_forward(x, w1, b1, w2, b2, w3, b3):
    h1 = jnp.maximum(x @ w1 + b1, 0.0)
    h2 = jnp.maximum(h1 @ w2 + b2, 0.0)
    return jax.nn.sigmoid(h2 @ w3 + b3)


if __name__ == "__main__":
    batch = 8
    input_dim = 16
    hidden_dim = 32
    output_dim = 4

    key = jax.random.PRNGKey(0)
    kx, kp = jax.random.split(key)
    x = jax.random.normal(kx, (batch, input_dim), jnp.float32)
    raw_params = init_params(kp, input_dim, hidden_dim, output_dim)

    ref = reference_forward(x, *raw_params)

    # Exact-precision path (f32 operands/store) — tight check vs pure-JAX ref.
    params_f32 = prepare_params(*raw_params, compute_dtype=jnp.float32)
    out_f32 = jax.block_until_ready(dqn_forward(x, params_f32))
    assert out_f32.shape == (batch, output_dim)
    assert jnp.allclose(out_f32, ref, atol=1e-5, rtol=1e-5), \
        "f32 kernel mismatch vs pure-JAX reference"

    # Performance path (bf16 operands + bf16 store, f32 MXU acc) — loose check.
    # NOTE: bf16 gives ~1e-2 deviation; confirm acceptable for the Q-loss.
    params_bf16 = prepare_params(*raw_params, compute_dtype=jnp.bfloat16)
    out_bf16 = jax.block_until_ready(dqn_forward(x, params_bf16))
    assert out_bf16.shape == (batch, output_dim)
    assert jnp.allclose(out_bf16.astype(jnp.float32), ref, atol=2e-2, rtol=2e-2), \
        "bf16 kernel mismatch vs pure-JAX reference"

    print("KERNEL_OK")
</pallas_src>

<mosaic_0001>
module attributes {stable_mosaic.version = 11 : i64} {
  func.func @dqn_kernel(%arg0: i32, %arg1: memref<8x16xf32, #tpu.memory_space<vmem>>, %arg2: memref<16x128xf32, #tpu.memory_space<vmem>>, %arg3: memref<1x128xf32, #tpu.memory_space<vmem>>, %arg4: memref<128x128xf32, #tpu.memory_space<vmem>>, %arg5: memref<1x128xf32, #tpu.memory_space<vmem>>, %arg6: memref<128x128xf32, #tpu.memory_space<vmem>>, %arg7: memref<1x128xf32, #tpu.memory_space<vmem>>, %arg8: memref<8x128xf32, #tpu.memory_space<vmem>>) attributes {dimension_semantics = [#tpu.dimension_semantics<parallel>], iteration_bounds = array<i64: 1>, scalar_prefetch = 0 : i64, scratch_operands = 0 : i64, tpu.core_type = #tpu.core_type<tc>, window_params = [{transform_indices = @transform_0, window_bounds = array<i64: 8, 16>}, {pipeline_mode = #tpu.pipeline_mode<synchronous>, transform_indices = @transform_1, window_bounds = array<i64: 16, 128>}, {pipeline_mode = #tpu.pipeline_mode<synchronous>, transform_indices = @transform_2, window_bounds = array<i64: 1, 128>}, {pipeline_mode = #tpu.pipeline_mode<synchronous>, transform_indices = @transform_3, window_bounds = array<i64: 128, 128>}, {pipeline_mode = #tpu.pipeline_mode<synchronous>, transform_indices = @transform_4, window_bounds = array<i64: 1, 128>}, {pipeline_mode = #tpu.pipeline_mode<synchronous>, transform_indices = @transform_5, window_bounds = array<i64: 128, 128>}, {pipeline_mode = #tpu.pipeline_mode<synchronous>, transform_indices = @transform_6, window_bounds = array<i64: 1, 128>}, {transform_indices = @transform_7, window_bounds = array<i64: 8, 128>}]} {
    %c0 = arith.constant 0 : index
    %c0_0 = arith.constant 0 : index
    %0 = vector.load %arg1[%c0, %c0_0] : memref<8x16xf32, #tpu.memory_space<vmem>>, vector<8x16xf32>
    %c0_1 = arith.constant 0 : index
    %c0_2 = arith.constant 0 : index
    %1 = vector.load %arg2[%c0_1, %c0_2] : memref<16x128xf32, #tpu.memory_space<vmem>>, vector<16x128xf32>
    %cst = arith.constant dense<0.000000e+00> : vector<8x128xf32>
    %2 = tpu.matmul %0, %1, %cst {dimension_numbers = #tpu.dot_dimension_numbers<[1], [0], [0], [1], [0, 0, 1, 1], [], []>} : vector<8x16xf32>, vector<16x128xf32>, vector<8x128xf32> -> vector<8x128xf32>
    %c0_3 = arith.constant 0 : index
    %c0_4 = arith.constant 0 : index
    %3 = vector.load %arg3[%c0_3, %c0_4] : memref<1x128xf32, #tpu.memory_space<vmem>>, vector<1x128xf32>
    %4 = vector.broadcast %3 : vector<1x128xf32> to vector<8x128xf32>
    %5 = arith.addf %2, %4 : vector<8x128xf32>
    %cst_5 = arith.constant 0.000000e+00 : f32
    %6 = vector.broadcast %cst_5 : f32 to vector<8x128xf32>
    %7 = arith.maximumf %5, %6 : vector<8x128xf32>
    %c0_6 = arith.constant 0 : index
    %c0_7 = arith.constant 0 : index
    %8 = vector.load %arg4[%c0_6, %c0_7] : memref<128x128xf32, #tpu.memory_space<vmem>>, vector<128x128xf32>
    %cst_8 = arith.constant dense<0.000000e+00> : vector<8x128xf32>
    %9 = tpu.matmul %7, %8, %cst_8 {dimension_numbers = #tpu.dot_dimension_numbers<[1], [0], [0], [1], [0, 0, 1, 1], [], []>} : vector<8x128xf32>, vector<128x128xf32>, vector<8x128xf32> -> vector<8x128xf32>
    %c0_9 = arith.constant 0 : index
    %c0_10 = arith.constant 0 : index
    %10 = vector.load %arg5[%c0_9, %c0_10] : memref<1x128xf32, #tpu.memory_space<vmem>>, vector<1x128xf32>
    %11 = vector.broadcast %10 : vector<1x128xf32> to vector<8x128xf32>
    %12 = arith.addf %9, %11 : vector<8x128xf32>
    %cst_11 = arith.constant 0.000000e+00 : f32
    %13 = vector.broadcast %cst_11 : f32 to vector<8x128xf32>
    %14 = arith.maximumf %12, %13 : vector<8x128xf32>
    %c0_12 = arith.constant 0 : index
    %c0_13 = arith.constant 0 : index
    %15 = vector.load %arg6[%c0_12, %c0_13] : memref<128x128xf32, #tpu.memory_space<vmem>>, vector<128x128xf32>
    %cst_14 = arith.constant dense<0.000000e+00> : vector<8x128xf32>
    %16 = tpu.matmul %14, %15, %cst_14 {dimension_numbers = #tpu.dot_dimension_numbers<[1], [0], [0], [1], [0, 0, 1, 1], [], []>} : vector<8x128xf32>, vector<128x128xf32>, vector<8x128xf32> -> vector<8x128xf32>
    %c0_15 = arith.constant 0 : index
    %c0_16 = arith.constant 0 : index
    %17 = vector.load %arg7[%c0_15, %c0_16] : memref<1x128xf32, #tpu.memory_space<vmem>>, vector<1x128xf32>
    %18 = vector.broadcast %17 : vector<1x128xf32> to vector<8x128xf32>
    %19 = arith.addf %16, %18 : vector<8x128xf32>
    %cst_17 = arith.constant 0.000000e+00 : f32
    %20 = vector.broadcast %cst_17 : f32 to vector<8x128xf32>
    %21 = arith.subf %20, %19 : vector<8x128xf32>
    %22 = math.exp %21 : vector<8x128xf32>
    %cst_18 = arith.constant 1.000000e+00 : f32
    %23 = vector.broadcast %cst_18 : f32 to vector<8x128xf32>
    %24 = arith.addf %23, %22 : vector<8x128xf32>
    %25 = tpu.reciprocal %24 : vector<8x128xf32> -> vector<8x128xf32>
    %c0_19 = arith.constant 0 : index
    %c0_20 = arith.constant 0 : index
    %26 = vector.load %arg8[%c0_19, %c0_20] : memref<8x128xf32, #tpu.memory_space<vmem>>, vector<8x128xf32>
    tpu.vector_store %arg8[%c0_19, %c0_20], %25 {strides = array<i32>} : memref<8x128xf32, #tpu.memory_space<vmem>>, vector<8x128xf32>,
    return
  }
  func.func @transform_0(%arg0: i32) -> (i32, i32) {
    %c0_i32 = arith.constant 0 : i32
    %c0_i32_0 = arith.constant 0 : i32
    return %arg0, %c0_i32 : i32, i32
  }
  func.func @transform_1(%arg0: i32) -> (i32, i32) {
    %c0_i32 = arith.constant 0 : i32
    %c0_i32_0 = arith.constant 0 : i32
    %c0_i32_1 = arith.constant 0 : i32
    return %c0_i32, %c0_i32_0 : i32, i32
  }
  func.func @transform_2(%arg0: i32) -> (i32, i32) {
    %c0_i32 = arith.constant 0 : i32
    %c0_i32_0 = arith.constant 0 : i32
    %c0_i32_1 = arith.constant 0 : i32
    return %c0_i32, %c0_i32_0 : i32, i32
  }
  func.func @transform_3(%arg0: i32) -> (i32, i32) {
    %c0_i32 = arith.constant 0 : i32
    %c0_i32_0 = arith.constant 0 : i32
    %c0_i32_1 = arith.constant 0 : i32
    return %c0_i32, %c0_i32_0 : i32, i32
  }
  func.func @transform_4(%arg0: i32) -> (i32, i32) {
    %c0_i32 = arith.constant 0 : i32
    %c0_i32_0 = arith.constant 0 : i32
    %c0_i32_1 = arith.constant 0 : i32
    return %c0_i32, %c0_i32_0 : i32, i32
  }
  func.func @transform_5(%arg0: i32) -> (i32, i32) {
    %c0_i32 = arith.constant 0 : i32
    %c0_i32_0 = arith.constant 0 : i32
    %c0_i32_1 = arith.constant 0 : i32
    return %c0_i32, %c0_i32_0 : i32, i32
  }
  func.func @transform_6(%arg0: i32) -> (i32, i32) {
    %c0_i32 = arith.constant 0 : i32
    %c0_i32_0 = arith.constant 0 : i32
    %c0_i32_1 = arith.constant 0 : i32
    return %c0_i32, %c0_i32_0 : i32, i32
  }
  func.func @transform_7(%arg0: i32) -> (i32, i32) {
    %c0_i32 = arith.constant 0 : i32
    %c0_i32_0 = arith.constant 0 : i32
    return %arg0, %c0_i32 : i32, i32
  }
}

</mosaic_0001>

<bundles_post_ra>
// kernel: tpu_custom_call.1
= control target key start
LH: loop header
LB: loop body
LE: loop exit
PB: predicated region body
PF: predicated region fallthrough
CT: control target
= control target key end

     0   :  { %12 = vsyncpa [#allocation3], 0  ;;  %s824_s0 = inlined_call_operand.hbm [shape: f32[8,16], index: 0, kind: input, shape index: {}]   ;;  %s825_s1 = inlined_call_operand.hbm [shape: f32[16,128], index: 1, kind: input, shape index: {}]   ;;  %s826_s2 = inlined_call_operand.vmem [shape: f32[1,128], index: 2, kind: input, shape index: {}]   ;;  %s827_s3 = inlined_call_operand.hbm [shape: f32[128,128], index: 3, kind: input, shape index: {}]   ;;  %s828_s4 = inlined_call_operand.vmem [shape: f32[1,128], index: 4, kind: input, shape index: {}]   ;;  %s829_s5 = inlined_call_operand.hbm [shape: f32[128,128], index: 5, kind: input, shape index: {}]   ;;  %s830_s6 = inlined_call_operand.vmem [shape: f32[1,128], index: 6, kind: input, shape index: {}]   ;;  %s831_s7 = inlined_call_operand.hbm [shape: f32[8,128], index: 7, kind: output, shape index: {}]  }
   0x1   :  { %13 = vsyncpa [#allocation6], 0 }
   0x2   :  { %14 = vsyncpa [#allocation9], 0 }
   0x3   :  { %15 = vsyncpa [#allocation4], 0  ;;  %s676_s24 = smov [#allocation5]   ;;  %s558_s28 = scalar_lea.hbm %s825_s1, 256 }
   0x4   :  { %s31_s25 = sshll.u32 %s676_s24, 4  ;;  %p559_p0 = scmp.ne.s32.totalorder %s825_s1, %s558_s28  ;;  %s32_s25 = int_to_ptr.vmem [resolvable:$true] %s31_s25 }
   0x5   :  { %p562_p1 = scmp.lt.u32.totalorder %s558_s28, %s825_s1 }
   0x7   :  { %p564_p2 = pnand %p562_p1, %p559_p0 }
   0x9   :  { %567 = shalt.err (!%p564_p2)
}
   0xa   :  { %s568_s10 = scalar_lea.vmem %s32_s25, 256  ;;  %p573_p4 = scmp.lt.s32.totalorder %s32_s25, %s32_s25 }
   0xb   :  { %p569_p3 = scmp.ne.s32.totalorder %s32_s25, %s568_s10  ;;  %p574_p5 = scmp.lt.s32.totalorder %s568_s10, %s568_s10 }
   0xd   :  { %p575_p6 = por %p574_p5, %p573_p4 }
   0xf   :  { %p576_p7 = pnand %p575_p6, %p569_p3 }
  0x11   :  { %579 = shalt.err (!%p576_p7)
}
  0x12   :  { %s677_s11 = smov 128   ;;  %s678_s12 = smov 8  }
  0x13   :  { %37 = dma.hbm_to_vmem [thread:$0]  %s825_s1, 256, %s32_s25, [#allocation6], %s677_s11, %s677_s11, %s678_s12  }
  0x14   :  { %s679_s15 = smov [#allocation2]   ;;  %s680_s17 = smov [#allocation7]  }
  0x15   :  { %s22_s16 = sshll.u32 %s679_s15, 4  ;;  %s45_s18 = sshll.u32 %s680_s17, 4  ;;  %s23_s16 = int_to_ptr.vmem [resolvable:$true] %s22_s16  ;;  %s46_s18 = int_to_ptr.vmem [resolvable:$true] %s45_s18 }
  0x16   :  { %s580_s21 = scalar_lea.hbm %s824_s0, 128 }
  0x17   :  { %p581_p8 = scmp.ne.s32.totalorder %s824_s0, %s580_s21  ;;  %p584_p9 = scmp.lt.u32.totalorder %s580_s21, %s824_s0 }
  0x19   :  { %p586_p10 = pnand %p584_p9, %p581_p8 }
  0x1b   :  { %589 = shalt.err (!%p586_p10)
}
  0x1c   :  { %s590_s1 = scalar_lea.vmem %s23_s16, 128  ;;  %p595_p12 = scmp.lt.s32.totalorder %s23_s16, %s23_s16 }
  0x1d   :  { %p591_p11 = scmp.ne.s32.totalorder %s23_s16, %s590_s1  ;;  %p596_p13 = scmp.lt.s32.totalorder %s590_s1, %s590_s1 }
  0x1f   :  { %p597_p0 = por %p596_p13, %p595_p12 }
  0x21   :  { %p598_p1 = pnand %p597_p0, %p591_p11 }
  0x23   :  { %601 = shalt.err (!%p598_p1)
}
  0x24   :  { %25 = dma.hbm_to_vmem [thread:$0]  %s824_s0, 128, %s23_s16, [#allocation3]  }
  0x25   :  { %s602_s30 = scalar_lea.hbm %s827_s3, 2048 }
  0x26   :  { %p603_p2 = scmp.ne.s32.totalorder %s827_s3, %s602_s30  ;;  %p606_p3 = scmp.lt.u32.totalorder %s602_s30, %s827_s3 }
  0x28   :  { %p608_p4 = pnand %p606_p3, %p603_p2 }
  0x2a   :  { %611 = shalt.err (!%p608_p4)
}
  0x2b   :  { %s612_s14 = scalar_lea.vmem %s46_s18, 2048  ;;  %p617_p6 = scmp.lt.s32.totalorder %s46_s18, %s46_s18 }
  0x2c   :  { %p613_p5 = scmp.ne.s32.totalorder %s46_s18, %s612_s14  ;;  %p618_p7 = scmp.lt.s32.totalorder %s612_s14, %s612_s14 }
  0x2e   :  { %p619_p8 = por %p618_p7, %p617_p6 }
  0x30   :  { %p620_p9 = pnand %p619_p8, %p613_p5 }
  0x32   :  { %623 = shalt.err (!%p620_p9)
}
  0x33   :  { %51 = dma.hbm_to_vmem [thread:$0]  %s827_s3, 2048, %s46_s18, [#allocation6], %s677_s11, %s677_s11, %s678_s12  }
  0x34   :  { %s681_s16 = smov [#allocation8]   ;;  %s624_s21 = scalar_lea.hbm %s829_s5, 2048 }
  0x35   :  { %s59_s17 = sshll.u32 %s681_s16, 4  ;;  %p625_p10 = scmp.ne.s32.totalorder %s829_s5, %s624_s21  ;;  %s60_s17 = int_to_ptr.vmem [resolvable:$true] %s59_s17 }
  0x36   :  { %p628_p11 = scmp.lt.u32.totalorder %s624_s21, %s829_s5 }
  0x38   :  { %p630_p12 = pnand %p628_p11, %p625_p10 }
  0x3a   :  { %633 = shalt.err (!%p630_p12)
}
  0x3b   :  { %s634_s1 = scalar_lea.vmem %s60_s17, 2048  ;;  %p639_p0 = scmp.lt.s32.totalorder %s60_s17, %s60_s17 }
  0x3c   :  { %p635_p13 = scmp.ne.s32.totalorder %s60_s17, %s634_s1  ;;  %p640_p1 = scmp.lt.s32.totalorder %s634_s1, %s634_s1 }
  0x3e   :  { %p641_p2 = por %p640_p1, %p639_p0 }
  0x40   :  { %p642_p3 = pnand %p641_p2, %p635_p13 }
  0x42   :  { %645 = shalt.err (!%p642_p3)
}
  0x43   :  { %65 = dma.hbm_to_vmem [thread:$0]  %s829_s5, 2048, %s60_s17, [#allocation9], %s677_s11, %s677_s11, %s678_s12  }
  0x44   :  { %668 = dma.done.wait [#allocation3], 128  }
  0x45   :  { %669 = vsyncadd [#allocation3], 4294967168 }
  0x46   :  { %670 = dma.done.wait [#allocation6], 2304  }
  0x47   :  { %671 = vsyncadd [#allocation6], 4294964992 }
  0x48   :  { %672 = dma.done.wait [#allocation9], 2048  }
  0x49   :  { %673 = vsyncadd [#allocation9], 4294965248  ;;  %v682_v0 = vmov 0.0|0.0   ;;  %vm683_vm0 = vmmov 0   ;;  %v684_v1 = vmov 0.0   ;;  %v81_v2 = vld [vmem:[#allocation5] sm:$0xff] }
  0x4a   :  { %493 = vmatprep.subr.bf16.mxu0 %v682_v0  ;;  %420 = vmatprep.mubr.msk.f32.mxu0 %vm683_vm0, %v684_v1  ;;  %v82_v3 = vld [vmem:[#allocation5 + $0x8] sm:$0xff]  ;;  %v165_v5 = vld [vmem:[#allocation7] sm:$0xff]  ;;  %v166_v6 = vld [vmem:[#allocation7 + $0x8] sm:$0xff]  ;;  %vm90_vm1 = vcmask 130048   ;;  %s685_s28 = smov [#allocation10]  }
  0x4b   :  { %496 = vmatprep.subr.bf16.mxu1 %v682_v0  ;;  %455 = vmatprep.mubr.msk.f32.mxu1 %vm683_vm0, %v684_v1  ;;  %v494_v4 = vpack.c.bf16 %v82_v3, %v81_v2  ;;  %v167_v7 = vld [vmem:[#allocation7 + $0x10] sm:$0xff]  ;;  %v497_v8 = vpack.c.bf16 %v166_v6, %v165_v5  ;;  %v168_v9 = vld [vmem:[#allocation7 + $0x18] sm:$0xff]  ;;  %v80_v10 = vld [vmem:[#allocation2] sm:$0xff] }
  0x4c   :  { %v500_v11 = vpack.c.bf16 %v168_v9, %v167_v7  ;;  %v169_v12 = vld [vmem:[#allocation7 + $0x20] sm:$0xff]  ;;  %v170_v13 = vld [vmem:[#allocation7 + $0x28] sm:$0xff]  ;;  %v171_v15 = vld [vmem:[#allocation7 + $0x30] sm:$0xff] }
  0x4d   :  { %495 = vmatpush3.bf16.msra.mxu0 %v494_v4  ;;  %498 = vmatpush3.bf16.msra.mxu1 %v497_v8  ;;  %v503_v14 = vpack.c.bf16 %v170_v13, %v169_v12  ;;  %v172_v16 = vld [vmem:[#allocation7 + $0x38] sm:$0xff]  ;;  %v173_v18 = vld [vmem:[#allocation7 + $0x40] sm:$0xff]  ;;  %v174_v19 = vld [vmem:[#allocation7 + $0x48] sm:$0xff] }
  0x4e   :  { %520 = vmatprep.subr.bf16.mxu0 %v682_v0  ;;  %499 = vmatprep.subr.bf16.mxu1 %v682_v0  ;;  %v506_v17 = vpack.c.bf16 %v172_v16, %v171_v15  ;;  %v509_v20 = vpack.c.bf16 %v174_v19, %v173_v18  ;;  %v175_v21 = vld [vmem:[#allocation7 + $0x50] sm:$0xff]  ;;  %v176_v22 = vld [vmem:[#allocation7 + $0x58] sm:$0xff]  ;;  %v177_v24 = vld [vmem:[#allocation7 + $0x60] sm:$0xff] }
  0x4f   :  { %v512_v23 = vpack.c.bf16 %v176_v22, %v175_v21  ;;  %v178_v25 = vld [vmem:[#allocation7 + $0x68] sm:$0xff]  ;;  %v179_v27 = vld [vmem:[#allocation7 + $0x70] sm:$0xff]  ;;  %v180_v28 = vld [vmem:[#allocation7 + $0x78] sm:$0xff] }
  0x50   :  { %421 = vmatmul.mubr.msk.f32.vlgmr.msra.gmra.mrb[0].mxu0 %vm90_vm1, %v80_v10  ;;  %v515_v26 = vpack.c.bf16 %v178_v25, %v177_v24  ;;  %v518_v29 = vpack.c.bf16 %v180_v28, %v179_v27  ;;  %v259_v30 = vld [vmem:[#allocation8] sm:$0xff]  ;;  %v260_v31 = vld [vmem:[#allocation8 + $0x8] sm:$0xff]  ;;  %v261_v32 = vld [vmem:[#allocation8 + $0x10] sm:$0xff] }
  0x51   :  { %490 = vmatprep.mubr.msk.f32.mxu0 %vm683_vm0, %v684_v1  ;;  %501 = vmatpush3.bf16.msra.mxu1 %v500_v11  ;;  %v521_v33 = vpack.c.bf16 %v260_v31, %v259_v30  ;;  %v262_v34 = vld [vmem:[#allocation8 + $0x18] sm:$0xff]  ;;  %v263_v36 = vld [vmem:[#allocation8 + $0x20] sm:$0xff]  ;;  %v264_v37 = vld [vmem:[#allocation8 + $0x28] sm:$0xff] }
  0x52   :  { %502 = vmatprep.subr.bf16.mxu1 %v682_v0  ;;  %v524_v35 = vpack.c.bf16 %v262_v34, %v261_v32  ;;  %v527_v38 = vpack.c.bf16 %v264_v37, %v263_v36  ;;  %v265_v39 = vld [vmem:[#allocation8 + $0x30] sm:$0xff]  ;;  %v266_v40 = vld [vmem:[#allocation8 + $0x38] sm:$0xff]  ;;  %v267_v42 = vld [vmem:[#allocation8 + $0x40] sm:$0xff] }
  0x53   :  { %522 = vmatpush3.bf16.msra.mxu0 %v521_v33  ;;  %v530_v41 = vpack.c.bf16 %v266_v40, %v265_v39  ;;  %v268_v43 = vld [vmem:[#allocation8 + $0x48] sm:$0xff]  ;;  %v269_v45 = vld [vmem:[#allocation8 + $0x50] sm:$0xff]  ;;  %v270_v46 = vld [vmem:[#allocation8 + $0x58] sm:$0xff] }
  0x54   :  { %523 = vmatprep.subr.bf16.mxu0 %v682_v0  ;;  %v533_v44 = vpack.c.bf16 %v268_v43, %v267_v42  ;;  %v536_v47 = vpack.c.bf16 %v270_v46, %v269_v45  ;;  %v271_v48 = vld [vmem:[#allocation8 + $0x60] sm:$0xff]  ;;  %v272_v49 = vld [vmem:[#allocation8 + $0x68] sm:$0xff]  ;;  %v273_v56 = vld [vmem:[#allocation8 + $0x70] sm:$0xff] }
  0x55   :  { %504 = vmatpush3.bf16.msra.mxu1 %v503_v14  ;;  %v539_v50 = vpack.c.bf16 %v272_v49, %v271_v48  ;;  %v375_v51 = vld [vmem:[%s826_s2] ss:$0 sm:$0xff]  ;;  %v274_v57 = vld [vmem:[#allocation8 + $0x78] sm:$0xff] }
  0x56   :  { %505 = vmatprep.subr.bf16.mxu1 %v682_v0  ;;  %v542_v58 = vpack.c.bf16 %v274_v57, %v273_v56  ;;  %v377_v59 = vld [vmem:[%s828_s4] ss:$0 sm:$0xff]  ;;  %s364_s4 = sshll.u32 %s685_s28, 4  ;;  %s365_s4 = int_to_ptr.vmem [resolvable:$true] %s364_s4 }
  0x57   :  { %525 = vmatpush3.bf16.msra.mxu0 %v524_v35  ;;  %s646_s29 = scalar_lea.vmem %s365_s4, 128  ;;  %p651_p5 = scmp.lt.s32.totalorder %s365_s4, %s365_s4 }
  0x58   :  { %526 = vmatprep.subr.bf16.mxu0 %v682_v0  ;;  %p647_p4 = scmp.ne.s32.totalorder %s365_s4, %s646_s29  ;;  %p652_p6 = scmp.lt.s32.totalorder %s646_s29, %s646_s29 }
  0x59   :  { %507 = vmatpush3.bf16.msra.mxu1 %v506_v17 }
  0x5a   :  { %508 = vmatprep.subr.bf16.mxu1 %v682_v0  ;;  %p653_p7 = por %p652_p6, %p651_p5 }
  0x5b   :  { %528 = vmatpush3.bf16.msra.mxu0 %v527_v38 }
  0x5c   :  { %529 = vmatprep.subr.bf16.mxu0 %v682_v0  ;;  %p654_p8 = pnand %p653_p7, %p647_p4 }
  0x5d   :  { %510 = vmatpush3.bf16.msra.mxu1 %v509_v20 }
  0x5e   :  { %511 = vmatprep.subr.bf16.mxu1 %v682_v0 }
  0x5f   :  { %531 = vmatpush3.bf16.msra.mxu0 %v530_v41 }
  0x60   :  { %532 = vmatprep.subr.bf16.mxu0 %v682_v0 }
  0x61   :  { %513 = vmatpush3.bf16.msra.mxu1 %v512_v23 }
  0x62   :  { %514 = vmatprep.subr.bf16.mxu1 %v682_v0 }
  0x63   :  { %534 = vmatpush3.bf16.msra.mxu0 %v533_v44 }
  0x64   :  { %535 = vmatprep.subr.bf16.mxu0 %v682_v0 }
  0x65   :  { %516 = vmatpush3.bf16.msra.mxu1 %v515_v26 }
  0x66   :  { %517 = vmatprep.subr.bf16.mxu1 %v682_v0 }
  0x67   :  { %537 = vmatpush3.bf16.msra.mxu0 %v536_v47 }
  0x68   :  { %538 = vmatprep.subr.bf16.mxu0 %v682_v0 }
  0x69   :  { %519 = vmatpush3.bf16.msra.mxu1 %v518_v29 }
  0x6b   :  { %540 = vmatpush3.bf16.msra.mxu0 %v539_v50 }
  0x6c   :  { %541 = vmatprep.subr.bf16.mxu0 %v682_v0  ;;  %v378_v0 = vld [vmem:[%s830_s6] ss:$0 sm:$0xff] }
  0x6f   :  { %543 = vmatpush3.bf16.msra.mxu0 %v542_v58 }
 0x123   :  { %v160_v52 = vpop.f32.mrb[0].mxu0 }
 0x124   :  { %v161_v53 = vadd.f32 %v375_v51, %v160_v52  ;;  %v422_v54 = vpop.f32.mrb[1].mxu0 }
 0x126   :  { %v164_v55 = vmax.f32 %v161_v53, 0.0 }
 0x128   :  { %456 = vmatmul.mubr.f32.vlgmr.msra.gmra.mrb[0].mxu1 %v164_v55 }
 0x1fb   :  { %v254_v60 = vpop.f32.mrb[0].mxu1 }
 0x1fc   :  { %v255_v61 = vadd.f32 %v377_v59, %v254_v60  ;;  %v457_v62 = vpop.f32.mrb[1].mxu1 }
 0x1fe   :  { %v258_v63 = vmax.f32 %v255_v61, 0.0 }
 0x200   :  { %491 = vmatmul.mubr.f32.vlgmr.msra.gmra.mrb[2].mxu0 %v258_v63 }
 0x2d3   :  { %v348_v1 = vpop.f32.mrb[2].mxu0 }
 0x2d4   :  { %v349_v2 = vadd.f32 %v378_v0, %v348_v1  ;;  %v492_v3 = vpop.f32.mrb[3].mxu0 }
 0x2d6   :  { %v352_v4 = vsub.f32 0.0, %v349_v2 }
 0x2d8   :  { %v353_v5 = vmul.f32 1.442695, %v352_v4 }
 0x2da   :  { %554 = vpow2.f32 %v353_v5 }
 0x2e4   :  { %v555_v6 = vpop.eup %554 }
 0x2e5   :  { %v355_v7 = vadd.f32 1.0, %v555_v6 }
 0x2e7   :  { %556 = vrcp.f32 %v355_v7 }
 0x2f1   :  { %v557_v8 = vpop.eup %556 }
 0x2f2   :  { %357 = vst [vmem:[#allocation10] sm:$0xff] %v557_v8 }
 0x2f3   :  { %657 = shalt.err (!%p654_p8)
}
 0x2f4   :  { %s658_s8 = scalar_lea.hbm %s831_s7, 128 }
 0x2f5   :  { %p659_p9 = scmp.ne.s32.totalorder %s831_s7, %s658_s8  ;;  %p662_p10 = scmp.lt.u32.totalorder %s658_s8, %s831_s7 }
 0x2f7   :  { %p664_p11 = pnand %p662_p10, %p659_p9 }
 0x2f9   :  { %667 = shalt.err (!%p664_p11)
}
 0x2fa   :  { %367 = dma.vmem_to_hbm [thread:$0]  %s365_s4, 128, %s831_s7, [#allocation4]  }
 0x2fb   :  { %674 = dma.done.wait [#allocation4], 128  }
 0x2fc   :  { %675 = vsyncadd [#allocation4], 4294967168 }
 0x2fd   :  { %371 = vsyncpa [#allocation3], 1 }
 0x2fe   :  { %372 = vsyncpa [#allocation6], 1 }
 0x2ff   :  { %373 = vsyncpa [#allocation9], 1 }
 0x300   :  { %374 = vsyncpa [#allocation4], 1 }

</bundles_post_ra>
